<compile_context>
chip_gen: v6e
topology: v6e:2x2x1
jax: 0.10.0
libtpu: 0.0.40
codegen_flags: <defaults>
</compile_context>

<pallas_src>
import jax
import jax.numpy as jnp
from jax import lax
from jax.experimental import pallas as pl
from jax.experimental.pallas import tpu as pltpu


def _clip_embedding_kernel(tok_ref, posc_ref, table_ref, out_ref):
    # tok_ref   : (TM, 1)   int32  — token id per row of this tile
    # posc_ref  : (TM, 1)   int32  — position column id (V + t) per row
    # table_ref : (V+T, E)  bf16   — [token table ; position table], resident
    # out_ref   : (TM, E)   f32    — lane-dense output tile
    TM = tok_ref.shape[0]
    VT = table_ref.shape[0]

    tok = tok_ref[...]                                        # (TM, 1)
    posc = posc_ref[...]                                      # (TM, 1)

    # Lane-dense iota over the combined (vocab + positions) axis.
    col_iota = lax.broadcasted_iota(jnp.int32, (TM, VT), 1)   # (TM, V+T)

    # Two hots per row: token column and position column (disjoint ranges, so
    # the sum of hits is exactly 2).  {0,1} is exact in bf16.
    # NOTE: out-of-range / negative token ids silently miss the token hot, so
    # the row degenerates to pos_emb only (PyTorch nn.Embedding would raise).
    twohot = ((col_iota == tok) | (col_iota == posc)).astype(jnp.bfloat16)

    # Gather + position add in ONE MXU matmul with f32 accumulation:
    #   out[n, e] = table[tok[n], e] + table[V + (n % T), e]
    out_ref[...] = jnp.dot(
        twohot, table_ref[...], preferred_element_type=jnp.float32
    ).astype(out_ref.dtype)


def clip_embedding(tokens, emb_table, pos_emb):
    """tokens: (B, T) int; emb_table: (V, E); pos_emb: (T, E) -> (B, T, E) f32.

    The table is fed to the MXU in bf16 (exact one-hot gather of bf16 rows,
    f32 accumulation), matching the PyTorch forward up to bf16 weight storage.
    """
    B, T = tokens.shape
    V, E = emb_table.shape
    assert pos_emb.shape == (T, E)
    N = B * T

    # Combined [token ; position] table, bf16 for the MXU.
    table = jnp.concatenate(
        [emb_table.astype(jnp.bfloat16), pos_emb.astype(jnp.bfloat16)], axis=0
    )                                                          # (V+T, E)

    # Column layouts so the hot compares broadcast against a lane-axis iota.
    tokens_col = tokens.reshape(N, 1).astype(jnp.int32)
    pos_col = (V + (jnp.arange(N, dtype=jnp.int32) % T)).reshape(N, 1)

    # Row-tile size: a single tile for small N (avoid per-step pipeline
    # overhead at toy shapes), 256-row parallel tiles otherwise (v7x 2-TC).
    if N > 256 and N % 256 == 0:
        TM = 256
    else:
        TM = N
    grid = (N // TM,)

    # VMEM budget: resident table + per-block two-hot + per-block output,
    # with headroom for double-buffered token/pos/out blocks.
    table_bytes = (V + T) * E * 2
    hot_bytes = TM * (V + T) * 2
    out_blk_bytes = TM * E * 4
    vmem_limit = int(
        min(100 << 20, max(32 << 20, 4 * (table_bytes + hot_bytes + out_blk_bytes)))
    )

    out_flat = pl.pallas_call(
        _clip_embedding_kernel,
        out_shape=jax.ShapeDtypeStruct((N, E), jnp.float32),
        grid_spec=pltpu.PrefetchScalarGridSpec(
            num_scalar_prefetch=0,
            grid=grid,
            in_specs=[
                pl.BlockSpec((TM, 1), lambda i: (i, 0)),        # token ids
                pl.BlockSpec((TM, 1), lambda i: (i, 0)),        # position cols
                pl.BlockSpec((V + T, E), lambda i: (0, 0)),     # table: resident
            ],
            out_specs=pl.BlockSpec((TM, E), lambda i: (i, 0)),
        ),
        compiler_params=pltpu.CompilerParams(
            dimension_semantics=("parallel",),
            vmem_limit_bytes=vmem_limit,
        ),
    )(tokens_col, pos_col, table)

    # Free row-major reshape back to the PyTorch (batch, seq, n_embd) layout.
    return out_flat.reshape(B, T, E)


if __name__ == "__main__":
    # Small shapes consistent with the module: n_vocab=128, n_embd=128, n_tokens=8
    B, T, V, E = 2, 8, 128, 128

    key = jax.random.PRNGKey(0)
    k_tok, k_emb, k_pos = jax.random.split(key, 3)

    tokens = jax.random.randint(k_tok, (B, T), 0, V, dtype=jnp.int32)
    # nn.Embedding default init ~ N(0, 1); position_embedding is zeros in
    # __init__, but use small random values here so the add is actually tested.
    emb_table = jax.random.normal(k_emb, (V, E), dtype=jnp.float32)
    pos_emb = 0.01 * jax.random.normal(k_pos, (T, E), dtype=jnp.float32)

    out = clip_embedding(tokens, emb_table, pos_emb)
    out = jax.block_until_ready(out)
    assert out.shape == (B, T, E)

    # Exact reference: the kernel gathers bf16 table rows and accumulates in
    # f32, so it must match the bf16-cast reference to float precision.
    emb_bf = emb_table.astype(jnp.bfloat16).astype(jnp.float32)
    pos_bf = pos_emb.astype(jnp.bfloat16).astype(jnp.float32)
    ref_bf = emb_bf[tokens] + pos_bf[None, :, :]
    assert jnp.allclose(out, ref_bf, atol=1e-6, rtol=1e-6), "mismatch vs bf16 reference"

    # Loose check against the full-f32 PyTorch-equivalent forward.
    ref_f32 = emb_table[tokens] + pos_emb[None, :, :]
    assert jnp.allclose(out, ref_f32, atol=3e-2, rtol=2e-2), "mismatch vs f32 reference"

    print("KERNEL_OK")
</pallas_src>

<mosaic_0001>
module attributes {stable_mosaic.version = 11 : i64} {
  func.func @_clip_embedding_kernel(%arg0: i32, %arg1: memref<16x1xi32, #tpu.memory_space<vmem>>, %arg2: memref<16x1xi32, #tpu.memory_space<vmem>>, %arg3: memref<136x128xbf16, #tpu.memory_space<vmem>>, %arg4: memref<16x128xf32, #tpu.memory_space<vmem>>) attributes {dimension_semantics = [#tpu.dimension_semantics<parallel>], iteration_bounds = array<i64: 1>, scalar_prefetch = 0 : i64, scratch_operands = 0 : i64, tpu.core_type = #tpu.core_type<tc>, window_params = [{transform_indices = @transform_0, window_bounds = array<i64: 16, 1>}, {transform_indices = @transform_1, window_bounds = array<i64: 16, 1>}, {pipeline_mode = #tpu.pipeline_mode<synchronous>, transform_indices = @transform_2, window_bounds = array<i64: 136, 128>}, {transform_indices = @transform_3, window_bounds = array<i64: 16, 128>}]} {
    %c0 = arith.constant 0 : index
    %c0_0 = arith.constant 0 : index
    %0 = vector.load %arg1[%c0, %c0_0] : memref<16x1xi32, #tpu.memory_space<vmem>>, vector<16x1xi32>
    %c0_1 = arith.constant 0 : index
    %c0_2 = arith.constant 0 : index
    %1 = vector.load %arg2[%c0_1, %c0_2] : memref<16x1xi32, #tpu.memory_space<vmem>>, vector<16x1xi32>
    %2 = tpu.iota {dimensions = array<i32: 1>} : vector<16x136xi32>
    %3 = vector.broadcast %0 : vector<16x1xi32> to vector<16x136xi32>
    %4 = arith.cmpi eq, %2, %3 : vector<16x136xi32>
    %5 = vector.broadcast %1 : vector<16x1xi32> to vector<16x136xi32>
    %6 = arith.cmpi eq, %2, %5 : vector<16x136xi32>
    %7 = arith.ori %4, %6 : vector<16x136xi1>
    %8 = arith.extui %7 : vector<16x136xi1> to vector<16x136xi32>
    %9 = arith.sitofp %8 : vector<16x136xi32> to vector<16x136xf32>
    %10 = arith.truncf %9 : vector<16x136xf32> to vector<16x136xbf16>
    %c0_3 = arith.constant 0 : index
    %c0_4 = arith.constant 0 : index
    %11 = vector.load %arg3[%c0_3, %c0_4] : memref<136x128xbf16, #tpu.memory_space<vmem>>, vector<136x128xbf16>
    %cst = arith.constant dense<0.000000e+00> : vector<16x128xf32>
    %12 = tpu.matmul %10, %11, %cst {dimension_numbers = #tpu.dot_dimension_numbers<[1], [0], [0], [1], [0, 0, 1, 1], [], []>} : vector<16x136xbf16>, vector<136x128xbf16>, vector<16x128xf32> -> vector<16x128xf32>
    %c0_5 = arith.constant 0 : index
    %c0_6 = arith.constant 0 : index
    %13 = vector.load %arg4[%c0_5, %c0_6] : memref<16x128xf32, #tpu.memory_space<vmem>>, vector<16x128xf32>
    tpu.vector_store %arg4[%c0_5, %c0_6], %12 {strides = array<i32>} : memref<16x128xf32, #tpu.memory_space<vmem>>, vector<16x128xf32>,
    return
  }
  func.func @transform_0(%arg0: i32) -> (i32, i32) {
    %c0_i32 = arith.constant 0 : i32
    %c0_i32_0 = arith.constant 0 : i32
    return %arg0, %c0_i32 : i32, i32
  }
  func.func @transform_1(%arg0: i32) -> (i32, i32) {
    %c0_i32 = arith.constant 0 : i32
    %c0_i32_0 = arith.constant 0 : i32
    return %arg0, %c0_i32 : i32, i32
  }
  func.func @transform_2(%arg0: i32) -> (i32, i32) {
    %c0_i32 = arith.constant 0 : i32
    %c0_i32_0 = arith.constant 0 : i32
    %c0_i32_1 = arith.constant 0 : i32
    return %c0_i32, %c0_i32_0 : i32, i32
  }
  func.func @transform_3(%arg0: i32) -> (i32, i32) {
    %c0_i32 = arith.constant 0 : i32
    %c0_i32_0 = arith.constant 0 : i32
    return %arg0, %c0_i32 : i32, i32
  }
}

</mosaic_0001>

<bundles_post_ra>
// kernel: tpu_custom_call.1
= control target key start
LH: loop header
LB: loop body
LE: loop exit
PB: predicated region body
PF: predicated region fallthrough
CT: control target
= control target key end

     0   :  { %8 = vsyncpa [#allocation3], 0  ;;  %s334_s0 = inlined_call_operand.vmem [shape: s32[16,1], index: 0, kind: input, shape index: {}]   ;;  %s335_s1 = inlined_call_operand.vmem [shape: s32[16,1], index: 1, kind: input, shape index: {}]   ;;  %s336_s2 = inlined_call_operand.hbm [shape: bf16[136,128], index: 2, kind: input, shape index: {}]   ;;  %s337_s3 = inlined_call_operand.hbm [shape: f32[16,128], index: 3, kind: output, shape index: {}]  }
   0x1   :  { %9 = vsyncpa [#allocation4], 0  ;;  %s287_s12 = smov [#allocation2]  }
   0x2   :  { %s19_s13 = sshll.u32 %s287_s12, 4  ;;  %s20_s13 = int_to_ptr.vmem [resolvable:$true] %s19_s13 }
   0x3   :  { %s251_s14 = scalar_lea.vmem %s20_s13, 1088  ;;  %p256_p1 = scmp.lt.s32.totalorder %s20_s13, %s20_s13 }
   0x4   :  { %p252_p0 = scmp.ne.s32.totalorder %s20_s13, %s251_s14  ;;  %p257_p2 = scmp.lt.s32.totalorder %s251_s14, %s251_s14 }
   0x6   :  { %p258_p3 = por %p257_p2, %p256_p1 }
   0x8   :  { %p259_p4 = pnand %p258_p3, %p252_p0 }
   0xa   :  { %262 = shalt.err (!%p259_p4)
}
   0xb   :  { %s288_s15 = smov 64   ;;  %s289_s16 = smov 4  }
   0xc   :  { %25 = dma.hbm_to_vmem [thread:$0]  %s336_s2, 1088, %s20_s13, [#allocation3], %s288_s15, %s288_s15, %s289_s16  }
   0xd   :  { %283 = dma.done.wait [#allocation3], 1088  }
   0xe   :  { %284 = vsyncadd [#allocation3], 4294966208  ;;  %v290_v0 = vmov 0   ;;  %v32_v1 = vld [vmem:[%s335_s1] sm:$0xff]  ;;  %v33_v3 = vld [vmem:[%s335_s1 + $0x8] sm:$0xff]  ;;  %vm143_vm0 = vcmask 1043456   ;;  %v34_v15 = vlaneseq }
   0xf   :  { %233 = vset.pattern.permute.xlu1 %v290_v0  ;;  %232 = vset.pattern.permute.xlu0 %v290_v0  ;;  %v30_v2 = vld [vmem:[%s334_s0] sm:$0xff]  ;;  %v31_v4 = vld [vmem:[%s334_s0 + $0x8] sm:$0xff]  ;;  %v234_v5 = vld [vmem:[#allocation2 + $0x38] sm:$0xff]   ;;  %v291_v22 = vmov 0.0   ;;  %vm139_vm12 = vcmask 64512   ;;  %s293_s0 = smov [#allocation5]  }
  0x10   :  { %147 = vmatprep.subr.bf16.mxu0 %v290_v0  ;;  %48 = vperm.xlu1 %233, %v32_v1   ;;  %v235_v6 = vld [vmem:[#allocation2 + $0x30] sm:$0xff]   ;;  %v236_v7 = vld [vmem:[#allocation2 + $0x28] sm:$0xff]   ;;  %v237_v8 = vld [vmem:[#allocation2 + $0x20] sm:$0xff]   ;;  %v35_v16 = vand.u32 127, %v34_v15  ;;  %v292_v26 = vmov 1.0|1.0  }
  0x11   :  { %38 = vperm.xlu0 %232, %v30_v2   ;;  %148 = vmatpush1.bf16.msra.mxu0 %v234_v5  ;;  %v238_v9 = vld [vmem:[#allocation2 + $0x18] sm:$0xff]   ;;  %v239_v10 = vld [vmem:[#allocation2 + $0x10] sm:$0xff]   ;;  %v240_v11 = vld [vmem:[#allocation2 + $0x8] sm:$0xff]   ;;  %s195_s1 = sshll.u32 %s293_s0, 4  ;;  %s196_s1 = int_to_ptr.vmem [resolvable:$true] %s195_s1 }
  0x12   :  { %149 = vmatprep.subr.bf16.mxu0 %v290_v0  ;;  %v241_v12 = vld [vmem:[#allocation2] sm:$0xff]   ;;  %v36_v17 = vadd.s32 128, %v35_v16  ;;  %s263_s26 = scalar_lea.vmem %s196_s1, 256  ;;  %p268_p6 = scmp.lt.s32.totalorder %s196_s1, %s196_s1 }
  0x13   :  { %v242_v13 = vld [vmem:[#allocation2 + $0x40] ss:$0 sps:$4 sm:$0xff]   ;;  %p264_p5 = scmp.ne.s32.totalorder %s196_s1, %s263_s26  ;;  %p269_p7 = scmp.lt.s32.totalorder %s263_s26, %s263_s26 }
  0x14   :  { %51 = vperm.xlu1 %233, %v33_v3   ;;  %v145_v14 = vsel %vm143_vm0, %v242_v13, 0 }
  0x15   :  { %41 = vperm.xlu0 %232, %v31_v4   ;;  %150 = vmatpush1.bf16.msra.mxu0 %v235_v6  ;;  %p270_p8 = por %p269_p7, %p268_p6 }
  0x16   :  { %151 = vmatprep.subr.bf16.mxu0 %v290_v0 }
  0x17   :  { %p271_p9 = pnand %p270_p8, %p264_p5 }
  0x19   :  { %152 = vmatpush1.bf16.msra.mxu0 %v236_v7 }
  0x1a   :  { %153 = vmatprep.subr.bf16.mxu0 %v290_v0 }
  0x1d   :  { %154 = vmatpush1.bf16.msra.mxu0 %v237_v8 }
  0x1e   :  { %155 = vmatprep.subr.bf16.mxu0 %v290_v0 }
  0x21   :  { %156 = vmatpush1.bf16.msra.mxu0 %v238_v9 }
  0x22   :  { %157 = vmatprep.subr.bf16.mxu0 %v290_v0 }
  0x25   :  { %158 = vmatpush1.bf16.msra.mxu0 %v239_v10 }
  0x26   :  { %159 = vmatprep.subr.bf16.mxu0 %v290_v0 }
  0x29   :  { %160 = vmatpush1.bf16.msra.mxu0 %v240_v11 }
  0x2a   :  { %161 = vmatprep.subr.bf16.mxu0 %v290_v0 }
  0x2d   :  { %162 = vmatpush1.bf16.msra.mxu0 %v241_v12 }
  0x2e   :  { %177 = vmatprep.subr.bf16.mxu0 %v290_v0 }
  0x31   :  { %178 = vmatpush2.bf16.msra.mxu0 %v145_v14 }
  0x8b   :  { %v49_v18 = vpop.permute.xlu1 %48 }
  0x8c   :  { %v39_v19 = vpop.permute.xlu0 %38  ;;  %vm54_vm1 = vcmp.eq.s32.totalorder %v36_v17, %v49_v18  ;;  %vm53_vm8 = vcmp.eq.s32.totalorder %v35_v16, %v49_v18 }
  0x8d   :  { %vm44_vm2 = vcmp.eq.s32.totalorder %v36_v17, %v39_v19  ;;  %vm43_vm9 = vcmp.eq.s32.totalorder %v35_v16, %v39_v19 }
  0x8e   :  { %vm58_vm3 = vmor %vm44_vm2, %vm54_vm1 }
  0x8f   :  { %v52_v20 = vpop.permute.xlu1 %51  ;;  %v208_v23 = vsel %vm58_vm3, 1.0, %v291_v22  ;;  %vm57_vm13 = vmor %vm43_vm9, %vm53_vm8 }
  0x90   :  { %v42_v21 = vpop.permute.xlu0 %41  ;;  %vm55_vm4 = vcmp.eq.s32.totalorder %v35_v16, %v52_v20  ;;  %vm56_vm5 = vcmp.eq.s32.totalorder %v36_v17, %v52_v20 }
  0x91   :  { %vm45_vm6 = vcmp.eq.s32.totalorder %v35_v16, %v42_v21  ;;  %vm46_vm7 = vcmp.eq.s32.totalorder %v36_v17, %v42_v21 }
  0x92   :  { %vm60_vm10 = vmor %vm46_vm7, %vm56_vm5 }
  0x93   :  { %vm59_vm11 = vmor %vm45_vm6, %vm55_vm4  ;;  %v210_v24 = vsel %vm60_vm10, 1.0, %v291_v22 }
  0x94   :  { %v70_v25 = vpack.c.bf16 %v210_v24, %v208_v23  ;;  %vm221_vm14 = vmpackc.low %vm59_vm11, %vm57_vm13 }
  0x96   :  { %220 = vmatprep.mubr.msk.bf16.mxu0 %vm139_vm12, %v70_v25 }
  0x97   :  { %222 = vmatmul.mubr.msk.bf16.vlgmr.msra.gmra.mxu0 %vm221_vm14, %v292_v26 }
 0x157   :  { %v181_v27 = vpop.f32.mrf.mxu0 }
 0x158   :  { %188 = vst [vmem:[#allocation5] sm:$0xff] %v181_v27 }
 0x159   :  { %v183_v28 = vpop.f32.mrf.mxu0 }
 0x15b   :  { %v184_v29 = vpop.f32.mrf.mxu0 }
 0x15c   :  { %189 = vst [vmem:[#allocation5 + $0x8] sm:$0xff] %v184_v29 }
 0x15d   :  { %v186_v30 = vpop.f32.mrf.mxu0 }
 0x15e   :  { %274 = shalt.err (!%p271_p9)
}
 0x15f   :  { %s294_s27 = smov 128   ;;  %s295_s28 = smov 8  }
 0x160   :  { %201 = dma.vmem_to_hbm [thread:$0]  %s196_s1, 256, %s337_s3, [#allocation4], %s294_s27, %s294_s27, %s295_s28  }
 0x161   :  { %285 = dma.done.wait [#allocation4], 256  }
 0x162   :  { %286 = vsyncadd [#allocation4], 4294967040 }
 0x163   :  { %205 = vsyncpa [#allocation3], 1 }
 0x164   :  { %206 = vsyncpa [#allocation4], 1 }

</bundles_post_ra>
